<compile_context>
chip_gen: v6e
topology: v6e:2x2x1
jax: 0.10.0
libtpu: 0.0.40
codegen_flags: <defaults>
</compile_context>

<pallas_src>
import functools

import jax
import jax.numpy as jnp
from jax.experimental import pallas as pl
from jax.experimental.pallas import tpu as pltpu

_VMEM_LIMIT = 48 * 1024 * 1024   # <= v7x 64MiB physical, > default scoped limits


# ------------------------------ tiling helpers ------------------------------

def _pick_tile(dim, target, align):
    """Largest tile <= target that divides `dim` and is a multiple of `align`.
    Falls back to the full dim (always a legal Pallas block)."""
    if dim <= target:
        return dim
    t = (target // align) * align
    while t >= align:
        if dim % t == 0:
            return t
        t -= align
    return dim


# -------------- fused LayerNorm + QKV projection (head-major out) ------------

def _ln_qkv_kernel(x_ref, g_ref, b_ref, wq_ref, wk_ref, wv_ref,
                   q_ref, k_ref, v_ref, xn_sc, *, eps, scale):
    hi = pl.program_id(1)

    @pl.when(hi == 0)                       # LN once per row tile, reused across heads
    def _():
        x = x_ref[...].astype(jnp.float32)
        mean = jnp.mean(x, axis=-1, keepdims=True)
        var = jnp.mean(jnp.square(x - mean), axis=-1, keepdims=True)
        xn = (x - mean) * jax.lax.rsqrt(var + eps)
        xn = xn * g_ref[...].astype(jnp.float32) + b_ref[...].astype(jnp.float32)
        xn_sc[...] = xn.astype(xn_sc.dtype)

    xn = xn_sc[...]                         # native dtype -> bf16-friendly MXU feed
    q = jnp.dot(xn, wq_ref[0], preferred_element_type=jnp.float32)
    q_ref[0] = (q * scale).astype(q_ref.dtype)          # softmax scale folded here
    k_ref[0] = jnp.dot(xn, wk_ref[0],
                       preferred_element_type=jnp.float32).astype(k_ref.dtype)
    v_ref[0] = jnp.dot(xn, wv_ref[0],
                       preferred_element_type=jnp.float32).astype(v_ref.dtype)


def ln_qkv_heads(x2d, ln_w, ln_b, wq, wk, wv, *, heads, head_dim, scale, eps=1e-5):
    """LayerNorm + Q/K/V projections, head-major outputs (heads, n, head_dim)."""
    n, c = x2d.shape
    dh = head_dim

    def head_major(w):                      # (c, heads*dh) -> (heads, c, dh); tiny weight shuffle
        return w.reshape(c, heads, dh).transpose(1, 0, 2)

    tm = _pick_tile(n, 512, 8)
    grid = (n // tm, heads)                 # heads innermost ("arbitrary") -> xn scratch reused
    w_spec = pl.BlockSpec((1, c, dh), lambda mi, hi: (hi, 0, 0))
    o_spec = pl.BlockSpec((1, tm, dh), lambda mi, hi: (hi, mi, 0))
    out_sd = jax.ShapeDtypeStruct((heads, n, dh), x2d.dtype)
    esz = x2d.dtype.itemsize
    return pl.pallas_call(
        functools.partial(_ln_qkv_kernel, eps=eps, scale=scale),
        grid=grid,
        out_shape=(out_sd, out_sd, out_sd),
        in_specs=[pl.BlockSpec((tm, c), lambda mi, hi: (mi, 0)),
                  pl.BlockSpec((1, c), lambda mi, hi: (0, 0)),
                  pl.BlockSpec((1, c), lambda mi, hi: (0, 0)),
                  w_spec, w_spec, w_spec],
        out_specs=(o_spec, o_spec, o_spec),
        scratch_shapes=[pltpu.VMEM((tm, c), x2d.dtype)],
        compiler_params=pltpu.CompilerParams(
            dimension_semantics=("parallel", "arbitrary"),
            vmem_limit_bytes=_VMEM_LIMIT),
        cost_estimate=pl.CostEstimate(
            flops=6 * n * c * heads * dh,
            transcendentals=0,
            bytes_accessed=esz * (n * c + 3 * c * heads * dh + 3 * n * heads * dh)),
    )(x2d, ln_w.reshape(1, c), ln_b.reshape(1, c),
      head_major(wq), head_major(wk), head_major(wv))


# ----------------- fused LayerNorm + FF1 matmul + GEGLU epilogue -------------

def _ln_geglu_kernel(x_ref, g_ref, b_ref, wh_ref, bh_ref, wg_ref, bg_ref,
                     o_ref, xn_sc, *, eps):
    ni = pl.program_id(1)

    @pl.when(ni == 0)                       # LN once per row tile, reused across column tiles
    def _():
        x = x_ref[...].astype(jnp.float32)
        mean = jnp.mean(x, axis=-1, keepdims=True)
        var = jnp.mean(jnp.square(x - mean), axis=-1, keepdims=True)
        xn = (x - mean) * jax.lax.rsqrt(var + eps)
        xn = xn * g_ref[...].astype(jnp.float32) + b_ref[...].astype(jnp.float32)
        xn_sc[...] = xn.astype(xn_sc.dtype)

    xn = xn_sc[...]
    h = jnp.dot(xn, wh_ref[...], preferred_element_type=jnp.float32) \
        + bh_ref[...].astype(jnp.float32)
    gg = jnp.dot(xn, wg_ref[...], preferred_element_type=jnp.float32) \
        + bg_ref[...].astype(jnp.float32)
    # exact (erf-based) GELU, matching torch.nn.functional.gelu default
    gelu = 0.5 * gg * (1.0 + jax.lax.erf(gg * 0.7071067811865476))
    o_ref[...] = (h * gelu).astype(o_ref.dtype)


def ln_ff_geglu(x2d, ln_w, ln_b, w1, b1, *, eps=1e-5):
    n, c = x2d.shape
    two_ff = w1.shape[1]
    ff = two_ff // 2
    tm = _pick_tile(n, 512, 8)
    tn = _pick_tile(ff, 512, 128)
    noff = ff // tn                          # block offset of the gate half inside w1 / b1
    grid = (n // tm, ff // tn)
    b1r = b1.reshape(1, two_ff)
    esz = x2d.dtype.itemsize
    return pl.pallas_call(
        functools.partial(_ln_geglu_kernel, eps=eps),
        grid=grid,
        out_shape=jax.ShapeDtypeStruct((n, ff), x2d.dtype),
        in_specs=[pl.BlockSpec((tm, c), lambda mi, ni: (mi, 0)),
                  pl.BlockSpec((1, c), lambda mi, ni: (0, 0)),
                  pl.BlockSpec((1, c), lambda mi, ni: (0, 0)),
                  pl.BlockSpec((c, tn), lambda mi, ni: (0, ni)),          # W1, value half
                  pl.BlockSpec((1, tn), lambda mi, ni: (0, ni)),          # b1, value half
                  pl.BlockSpec((c, tn), lambda mi, ni: (0, ni + noff)),   # W1, gate half
                  pl.BlockSpec((1, tn), lambda mi, ni: (0, ni + noff))],  # b1, gate half
        out_specs=pl.BlockSpec((tm, tn), lambda mi, ni: (mi, ni)),
        scratch_shapes=[pltpu.VMEM((tm, c), x2d.dtype)],
        compiler_params=pltpu.CompilerParams(
            dimension_semantics=("parallel", "arbitrary"),
            vmem_limit_bytes=_VMEM_LIMIT),
        cost_estimate=pl.CostEstimate(
            flops=4 * n * c * ff,
            transcendentals=n * ff,
            bytes_accessed=esz * (n * c + c * two_ff + n * ff)),
    )(x2d, ln_w.reshape(1, c), ln_b.reshape(1, c), w1, b1r, w1, b1r)


# --------------- tiled matmul + bias + residual (FF2 projection) -------------

def _linear_res_kernel(x_ref, w_ref, b_ref, r_ref, o_ref, acc_ref):
    ki = pl.program_id(2)

    @pl.when(ki == 0)
    def _():
        acc_ref[...] = jnp.zeros(acc_ref.shape, jnp.float32)

    acc_ref[...] += jnp.dot(x_ref[...], w_ref[...],
                            preferred_element_type=jnp.float32)

    @pl.when(ki == pl.num_programs(2) - 1)
    def _():
        o_ref[...] = (acc_ref[...] + b_ref[...].astype(jnp.float32)
                      + r_ref[...].astype(jnp.float32)).astype(o_ref.dtype)


def linear_bias_residual(x2d, w, b, res2d):
    m, kdim = x2d.shape
    n = w.shape[1]
    tm = _pick_tile(m, 512, 8)
    tn = _pick_tile(n, 256, 128)
    tk = _pick_tile(kdim, 512, 128)
    grid = (m // tm, n // tn, kdim // tk)
    esz = x2d.dtype.itemsize
    return pl.pallas_call(
        _linear_res_kernel,
        grid=grid,
        out_shape=jax.ShapeDtypeStruct((m, n), x2d.dtype),
        in_specs=[pl.BlockSpec((tm, tk), lambda mi, ni, ki: (mi, ki)),
                  pl.BlockSpec((tk, tn), lambda mi, ni, ki: (ki, ni)),
                  pl.BlockSpec((1, tn), lambda mi, ni, ki: (0, ni)),
                  pl.BlockSpec((tm, tn), lambda mi, ni, ki: (mi, ni))],
        out_specs=pl.BlockSpec((tm, tn), lambda mi, ni, ki: (mi, ni)),
        scratch_shapes=[pltpu.VMEM((tm, tn), jnp.float32)],
        compiler_params=pltpu.CompilerParams(
            dimension_semantics=("parallel", "parallel", "arbitrary"),
            vmem_limit_bytes=_VMEM_LIMIT),
        cost_estimate=pl.CostEstimate(
            flops=2 * m * kdim * n,
            transcendentals=0,
            bytes_accessed=esz * (m * kdim + kdim * n + 2 * m * n + n)),
    )(x2d, w, b.reshape(1, n), res2d)


# ---------- flash attention (heads on grid) + fused out-proj/residual --------

def _flash_oproj_kernel(q_ref, k_ref, v_ref, wo_ref, bo_ref, r_ref, o_ref,
                        m_sc, l_sc, acc_sc, oacc_sc):
    hi = pl.program_id(2)
    ki = pl.program_id(3)
    nh = pl.num_programs(2)
    nk = pl.num_programs(3)
    last_k = ki == nk - 1

    @pl.when(ki == 0)
    def _():
        m_sc[...] = jnp.full(m_sc.shape, -jnp.inf, jnp.float32)
        l_sc[...] = jnp.zeros(l_sc.shape, jnp.float32)
        acc_sc[...] = jnp.zeros(acc_sc.shape, jnp.float32)

    q = q_ref[0, 0]                                     # (tq, dh) native dtype (scale pre-folded)
    k = k_ref[0, 0]                                     # (tkv, dh)
    s_mat = jax.lax.dot_general(q, k, (((1,), (1,)), ((), ())),
                                preferred_element_type=jnp.float32)      # (tq, tkv)
    m_prev = m_sc[...]
    m_new = jnp.maximum(m_prev, jnp.max(s_mat, axis=-1, keepdims=True))
    alpha = jnp.exp(m_prev - m_new)
    p = jnp.exp(s_mat - m_new)
    l_sc[...] = alpha * l_sc[...] + jnp.sum(p, axis=-1, keepdims=True)
    acc_sc[...] = alpha * acc_sc[...] + jnp.dot(p.astype(v_ref.dtype), v_ref[0, 0],
                                                preferred_element_type=jnp.float32)
    m_sc[...] = m_new

    @pl.when(jnp.logical_and(last_k, hi == 0))
    def _():
        oacc_sc[...] = jnp.zeros(oacc_sc.shape, jnp.float32)

    @pl.when(last_k)                                    # per-head out-projection, fused
    def _():
        o_h = (acc_sc[...] / l_sc[...]).astype(wo_ref.dtype)   # exact softmax normalization
        oacc_sc[...] += jnp.dot(o_h, wo_ref[0], preferred_element_type=jnp.float32)

    @pl.when(jnp.logical_and(last_k, hi == nh - 1))     # bias + residual epilogue
    def _():
        o_ref[0] = (oacc_sc[...] + bo_ref[...].astype(jnp.float32)
                    + r_ref[0].astype(jnp.float32)).astype(o_ref.dtype)


def flash_attention_out_proj(q, k, v, wo, bo, residual, *, heads, head_dim):
    """q/k/v: (heads, nb, rows, dh). Self-attention (no mask) per (head, batch),
    fused with the to_out projection, bias and residual add.
    residual: (nb, rows, c); output: (nb, rows, c)."""
    _, nb, rows, dh = q.shape
    rk = k.shape[2]
    c = wo.shape[1]
    woh = wo.reshape(heads, dh, c)                      # free reshape (head-major rows of Wo)
    tq = _pick_tile(rows, 256, 8)
    tkv = _pick_tile(rk, 512, 128)
    grid = (nb, rows // tq, heads, rk // tkv)           # qi outer of heads -> oacc valid
    q_spec = pl.BlockSpec((1, 1, tq, dh), lambda bi, qi, hi, ki: (hi, bi, qi, 0))
    kv_spec = pl.BlockSpec((1, 1, tkv, dh), lambda bi, qi, hi, ki: (hi, bi, ki, 0))
    x_spec = pl.BlockSpec((1, tq, c), lambda bi, qi, hi, ki: (bi, qi, 0))
    esz = q.dtype.itemsize
    return pl.pallas_call(
        _flash_oproj_kernel,
        grid=grid,
        out_shape=jax.ShapeDtypeStruct((nb, rows, c), residual.dtype),
        in_specs=[q_spec, kv_spec, kv_spec,
                  pl.BlockSpec((1, dh, c), lambda bi, qi, hi, ki: (hi, 0, 0)),
                  pl.BlockSpec((1, c), lambda bi, qi, hi, ki: (0, 0)),
                  x_spec],
        out_specs=x_spec,
        scratch_shapes=[pltpu.VMEM((tq, 1), jnp.float32),        # running max
                        pltpu.VMEM((tq, 1), jnp.float32),        # running sum
                        pltpu.VMEM((tq, dh), jnp.float32),       # running per-head acc
                        pltpu.VMEM((tq, c), jnp.float32)],       # out-proj accumulator
        compiler_params=pltpu.CompilerParams(
            dimension_semantics=("parallel", "parallel", "arbitrary", "arbitrary"),
            vmem_limit_bytes=_VMEM_LIMIT),
        cost_estimate=pl.CostEstimate(
            flops=4 * heads * nb * rows * rk * dh + 2 * nb * rows * heads * dh * c,
            transcendentals=heads * nb * rows * rk,
            bytes_accessed=esz * (heads * nb * (rows + 2 * rk) * dh
                                  + heads * dh * c + 2 * nb * rows * c)),
    )(q, k, v, woh, bo.reshape(1, c), residual)


# ------- temporal attention: batched tiny-seq attention + fused out-proj ------

def _temporal_attn_oproj_kernel(q_ref, k_ref, v_ref, wo_ref, bo_ref, r_ref, o_ref,
                                oacc_sc):
    hi = pl.program_id(1)
    nh = pl.num_programs(1)
    _, tb, nf, dh = q_ref.shape

    @pl.when(hi == 0)
    def _():
        oacc_sc[...] = jnp.zeros(oacc_sc.shape, jnp.float32)

    q = q_ref[0]                                        # (tb, nf, dh), native dtype, scale folded
    k = k_ref[0]
    v = v_ref[0]
    s_mat = jnp.einsum('bqd,bkd->bqk', q, k,
                       preferred_element_type=jnp.float32)               # (tb, nf, nf)
    m = jnp.max(s_mat, axis=-1, keepdims=True)
    p = jnp.exp(s_mat - m)
    l = jnp.sum(p, axis=-1, keepdims=True)
    o = jnp.einsum('bqk,bkd->bqd', p.astype(v_ref.dtype), v,
                   preferred_element_type=jnp.float32)                   # (tb, nf, dh)
    o = (o / l).reshape(tb * nf, dh).astype(wo_ref.dtype)
    oacc_sc[...] += jnp.dot(o, wo_ref[0], preferred_element_type=jnp.float32)

    @pl.when(hi == nh - 1)
    def _():
        out = oacc_sc[...] + bo_ref[...].astype(jnp.float32)             # (tb*nf, c)
        out = out.reshape(o_ref.shape) + r_ref[...].astype(jnp.float32)
        o_ref[...] = out.astype(o_ref.dtype)


def temporal_attention_out_proj(q, k, v, wo, bo, residual, *, heads, head_dim):
    """q/k/v: (heads, nt, f, dh) with nt = b*s spatial tokens and a tiny frame axis.
    Many tokens per grid step; out-projection + bias + residual fused."""
    _, nt, nf, dh = q.shape
    c = wo.shape[1]
    woh = wo.reshape(heads, dh, c)
    tb = _pick_tile(nt, 128, 8)
    grid = (nt // tb, heads)
    qkv_spec = pl.BlockSpec((1, tb, nf, dh), lambda bi, hi: (hi, bi, 0, 0))
    x_spec = pl.BlockSpec((tb, nf, c), lambda bi, hi: (bi, 0, 0))
    esz = q.dtype.itemsize
    return pl.pallas_call(
        _temporal_attn_oproj_kernel,
        grid=grid,
        out_shape=jax.ShapeDtypeStruct((nt, nf, c), residual.dtype),
        in_specs=[qkv_spec, qkv_spec, qkv_spec,
                  pl.BlockSpec((1, dh, c), lambda bi, hi: (hi, 0, 0)),
                  pl.BlockSpec((1, c), lambda bi, hi: (0, 0)),
                  x_spec],
        out_specs=x_spec,
        scratch_shapes=[pltpu.VMEM((tb * nf, c), jnp.float32)],
        compiler_params=pltpu.CompilerParams(
            dimension_semantics=("parallel", "arbitrary"),
            vmem_limit_bytes=_VMEM_LIMIT),
        cost_estimate=pl.CostEstimate(
            flops=4 * heads * nt * nf * nf * dh + 2 * nt * nf * heads * dh * c,
            transcendentals=heads * nt * nf * nf,
            bytes_accessed=esz * (3 * heads * nt * nf * dh + heads * dh * c
                                  + 2 * nt * nf * c)),
    )(q, k, v, woh, bo.reshape(1, c), residual)


# --------------------------------- params -----------------------------------

def init_params(key, dim, heads, head_dim, ff_mult=4, dtype=jnp.float32):
    inner = heads * head_dim
    ff_inner = dim * ff_mult
    ks = jax.random.split(key, 6)

    def w(k, shape, scale=0.02):
        return (scale * jax.random.normal(k, shape, dtype)).astype(dtype)

    return {
        # norm1 / norm3 / norm_temporal: default LayerNorm affine init
        'norm1_w': jnp.ones((dim,), dtype), 'norm1_b': jnp.zeros((dim,), dtype),
        'norm3_w': jnp.ones((dim,), dtype), 'norm3_b': jnp.zeros((dim,), dtype),
        'normt_w': jnp.ones((dim,), dtype), 'normt_b': jnp.zeros((dim,), dtype),
        # attn1 (SparseCausalFullAttention): q/k/v no bias, to_out has bias
        'attn1_wq': w(ks[0], (dim, inner)),
        'attn1_wk': w(ks[1], (dim, inner)),
        'attn1_wv': w(ks[2], (dim, inner)),
        'attn1_wo': w(ks[3], (inner, dim)),
        'attn1_bo': jnp.zeros((dim,), dtype),
        # feedforward: GEGLU proj (dim -> 2*ff_inner) then (ff_inner -> dim)
        'ff_w1': w(ks[4], (dim, 2 * ff_inner)),
        'ff_b1': jnp.zeros((2 * ff_inner,), dtype),
        'ff_w2': w(ks[5], (ff_inner, dim)),
        'ff_b2': jnp.zeros((dim,), dtype),
        # attn_temporal: zero_module -> all params zero
        'attnt_wq': jnp.zeros((dim, inner), dtype),
        'attnt_wk': jnp.zeros((dim, inner), dtype),
        'attnt_wv': jnp.zeros((dim, inner), dtype),
        'attnt_wo': jnp.zeros((inner, dim), dtype),
        'attnt_bo': jnp.zeros((dim,), dtype),
    }


# -------------------------------- forward -----------------------------------

def spatio_temporal_transformer_block(params, hidden_states, clip_length, heads, head_dim):
    bf, s, c = hidden_states.shape
    f = clip_length if clip_length is not None else 1
    b = bf // f
    dh = head_dim
    scale = float(head_dim) ** -0.5
    x = hidden_states

    # ---------- spatial attention (SparseCausalFullAttention) + residual -----
    q, k, v = ln_qkv_heads(x.reshape(bf * s, c), params['norm1_w'], params['norm1_b'],
                           params['attn1_wq'], params['attn1_wk'], params['attn1_wv'],
                           heads=heads, head_dim=dh, scale=scale)   # (heads, bf*s, dh)
    if clip_length is not None and clip_length > 1:
        # every query frame attends to ALL frames' tokens -> fold frames into the
        # query-row axis; q and k/v share one (heads, b, f*s, dh) layout (no broadcast).
        nb, rows = b, f * s
    else:
        nb, rows = bf, s
    q = q.reshape(heads, nb, rows, dh)
    k = k.reshape(heads, nb, rows, dh)
    v = v.reshape(heads, nb, rows, dh)
    x = flash_attention_out_proj(q, k, v, params['attn1_wo'], params['attn1_bo'],
                                 x.reshape(nb, rows, c),
                                 heads=heads, head_dim=dh).reshape(bf, s, c)
    # to_out dropout is identity in eval; attn2 is None (cross_attention_dim=None)

    # ---------------------- feedforward (GEGLU) + residual --------------------
    act = ln_ff_geglu(x.reshape(bf * s, c), params['norm3_w'], params['norm3_b'],
                      params['ff_w1'], params['ff_b1'])             # (bf*s, ff_inner)
    x = linear_bias_residual(act, params['ff_w2'], params['ff_b2'],
                             x.reshape(bf * s, c)).reshape(bf, s, c)

    # --------- temporal attention ('after_feedforward'), zero-initialized -----
    if clip_length is not None:
        # TODO(synk): the '(b f) d c -> (b d) f c' rearrange (and its inverse) stay
        # XLA transposes; fusing them into an out_spec needs c % 128 == 0 lane-dense blocks.
        xt = x.reshape(b, f, s, c).transpose(0, 2, 1, 3).reshape(b * s, f, c)
        qt, kt, vt = ln_qkv_heads(xt.reshape(b * s * f, c),
                                  params['normt_w'], params['normt_b'],
                                  params['attnt_wq'], params['attnt_wk'], params['attnt_wv'],
                                  heads=heads, head_dim=dh, scale=scale)
        qt = qt.reshape(heads, b * s, f, dh)
        kt = kt.reshape(heads, b * s, f, dh)
        vt = vt.reshape(heads, b * s, f, dh)
        xt = temporal_attention_out_proj(qt, kt, vt, params['attnt_wo'], params['attnt_bo'],
                                         xt, heads=heads, head_dim=dh)  # (b*s, f, c)
        x = xt.reshape(b, s, f, c).transpose(0, 2, 1, 3).reshape(bf, s, c)

    return x


if __name__ == "__main__":
    key = jax.random.PRNGKey(0)
    B, F, S, C = 2, 4, 16, 32          # batch, frames (clip_length), spatial tokens, dim
    heads, head_dim = 4, 8             # num_attention_heads, attention_head_dim

    kx, kp = jax.random.split(key)
    hidden_states = jax.random.normal(kx, (B * F, S, C), jnp.float32)
    params = init_params(kp, C, heads, head_dim)

    out = spatio_temporal_transformer_block(params, hidden_states,
                                            clip_length=F, heads=heads, head_dim=head_dim)
    out = jax.block_until_ready(out)
    assert out.shape == (B * F, S, C)
    assert bool(jnp.all(jnp.isfinite(out)))
    print("KERNEL_OK")
</pallas_src>

<mosaic_0001>
module attributes {stable_mosaic.version = 11 : i64} {
  func.func @_ln_qkv_kernel(%arg0: i32, %arg1: i32, %arg2: memref<128x32xf32, #tpu.memory_space<vmem>>, %arg3: memref<1x32xf32, #tpu.memory_space<vmem>>, %arg4: memref<1x32xf32, #tpu.memory_space<vmem>>, %arg5: memref<1x32x8xf32, #tpu.memory_space<vmem>>, %arg6: memref<1x32x8xf32, #tpu.memory_space<vmem>>, %arg7: memref<1x32x8xf32, #tpu.memory_space<vmem>>, %arg8: memref<1x128x8xf32, #tpu.memory_space<vmem>>, %arg9: memref<1x128x8xf32, #tpu.memory_space<vmem>>, %arg10: memref<1x128x8xf32, #tpu.memory_space<vmem>>, %arg11: memref<128x32xf32, #tpu.memory_space<vmem>>) attributes {dimension_semantics = [#tpu.dimension_semantics<parallel>, #tpu.dimension_semantics<arbitrary>], iteration_bounds = array<i64: 1, 4>, scalar_prefetch = 0 : i64, scratch_operands = 1 : i64, tpu.core_type = #tpu.core_type<tc>, window_params = [{transform_indices = @transform_0, window_bounds = array<i64: 128, 32>}, {pipeline_mode = #tpu.pipeline_mode<synchronous>, transform_indices = @transform_1, window_bounds = array<i64: 1, 32>}, {pipeline_mode = #tpu.pipeline_mode<synchronous>, transform_indices = @transform_2, window_bounds = array<i64: 1, 32>}, {transform_indices = @transform_3, window_bounds = array<i64: 1, 32, 8>}, {transform_indices = @transform_4, window_bounds = array<i64: 1, 32, 8>}, {transform_indices = @transform_5, window_bounds = array<i64: 1, 32, 8>}, {transform_indices = @transform_6, window_bounds = array<i64: 1, 128, 8>}, {transform_indices = @transform_7, window_bounds = array<i64: 1, 128, 8>}, {transform_indices = @transform_8, window_bounds = array<i64: 1, 128, 8>}]} {
    %c0_i32 = arith.constant 0 : i32
    %0 = arith.cmpi eq, %arg1, %c0_i32 : i32
    %1 = arith.extui %0 : i1 to i32
    %c0_i32_0 = arith.constant 0 : i32
    %2 = arith.cmpi ne, %1, %c0_i32_0 : i32
    scf.if %2 {
      %c0_23 = arith.constant 0 : index
      %c0_24 = arith.constant 0 : index
      %24 = vector.load %arg2[%c0_23, %c0_24] : memref<128x32xf32, #tpu.memory_space<vmem>>, vector<128x32xf32>
      %cst_25 = arith.constant dense<0.000000e+00> : vector<128xf32>
      %25 = vector.multi_reduction <add>, %24, %cst_25 [1] : vector<128x32xf32> to vector<128xf32>
      %26 = vector.shape_cast %25 : vector<128xf32> to vector<128x1xf32>
      %cst_26 = arith.constant 3.200000e+01 : f32
      %27 = vector.broadcast %cst_26 : f32 to vector<128x1xf32>
      %28 = arith.divf %26, %27 : vector<128x1xf32>
      %29 = vector.broadcast %28 : vector<128x1xf32> to vector<128x32xf32>
      %30 = arith.subf %24, %29 : vector<128x32xf32>
      %31 = arith.mulf %30, %30 : vector<128x32xf32>
      %cst_27 = arith.constant dense<0.000000e+00> : vector<128xf32>
      %32 = vector.multi_reduction <add>, %31, %cst_27 [1] : vector<128x32xf32> to vector<128xf32>
      %33 = vector.shape_cast %32 : vector<128xf32> to vector<128x1xf32>
      %cst_28 = arith.constant 3.200000e+01 : f32
      %34 = vector.broadcast %cst_28 : f32 to vector<128x1xf32>
      %35 = arith.divf %33, %34 : vector<128x1xf32>
      %36 = vector.broadcast %28 : vector<128x1xf32> to vector<128x32xf32>
      %37 = arith.subf %24, %36 : vector<128x32xf32>
      %cst_29 = arith.constant 9.99999974E-6 : f32
      %38 = vector.broadcast %cst_29 : f32 to vector<128x1xf32>
      %39 = arith.addf %35, %38 : vector<128x1xf32>
      %40 = math.rsqrt %39 : vector<128x1xf32>
      %41 = vector.broadcast %40 : vector<128x1xf32> to vector<128x32xf32>
      %42 = arith.mulf %37, %41 : vector<128x32xf32>
      %c0_30 = arith.constant 0 : index
      %c0_31 = arith.constant 0 : index
      %43 = vector.load %arg3[%c0_30, %c0_31] : memref<1x32xf32, #tpu.memory_space<vmem>>, vector<1x32xf32>
      %44 = vector.broadcast %43 : vector<1x32xf32> to vector<128x32xf32>
      %45 = arith.mulf %42, %44 : vector<128x32xf32>
      %c0_32 = arith.constant 0 : index
      %c0_33 = arith.constant 0 : index
      %46 = vector.load %arg4[%c0_32, %c0_33] : memref<1x32xf32, #tpu.memory_space<vmem>>, vector<1x32xf32>
      %47 = vector.broadcast %46 : vector<1x32xf32> to vector<128x32xf32>
      %48 = arith.addf %45, %47 : vector<128x32xf32>
      %c0_34 = arith.constant 0 : index
      %c0_35 = arith.constant 0 : index
      %49 = vector.load %arg11[%c0_34, %c0_35] : memref<128x32xf32, #tpu.memory_space<vmem>>, vector<128x32xf32>
      tpu.vector_store %arg11[%c0_34, %c0_35], %48 {strides = array<i32>} : memref<128x32xf32, #tpu.memory_space<vmem>>, vector<128x32xf32>,
    } else {
    }
    %c0 = arith.constant 0 : index
    %c0_1 = arith.constant 0 : index
    %3 = vector.load %arg11[%c0, %c0_1] : memref<128x32xf32, #tpu.memory_space<vmem>>, vector<128x32xf32>
    %c0_2 = arith.constant 0 : index
    %c0_3 = arith.constant 0 : index
    %c0_4 = arith.constant 0 : index
    %4 = vector.load %arg5[%c0_2, %c0_3, %c0_4] : memref<1x32x8xf32, #tpu.memory_space<vmem>>, vector<1x32x8xf32>
    %5 = vector.shape_cast %4 : vector<1x32x8xf32> to vector<32x8xf32>
    %cst = arith.constant dense<0.000000e+00> : vector<128x8xf32>
    %6 = tpu.matmul %3, %5, %cst {dimension_numbers = #tpu.dot_dimension_numbers<[1], [0], [0], [1], [0, 0, 1, 1], [], []>} : vector<128x32xf32>, vector<32x8xf32>, vector<128x8xf32> -> vector<128x8xf32>
    %cst_5 = arith.constant 0.353553385 : f32
    %7 = vector.broadcast %cst_5 : f32 to vector<128x8xf32>
    %8 = arith.mulf %6, %7 : vector<128x8xf32>
    %c0_6 = arith.constant 0 : index
    %c0_7 = arith.constant 0 : index
    %c0_8 = arith.constant 0 : index
    %9 = vector.load %arg8[%c0_6, %c0_7, %c0_8] : memref<1x128x8xf32, #tpu.memory_space<vmem>>, vector<1x128x8xf32>
    %10 = vector.shape_cast %9 : vector<1x128x8xf32> to vector<128x8xf32>
    %11 = vector.shape_cast %8 : vector<128x8xf32> to vector<1x128x8xf32>
    tpu.vector_store %arg8[%c0_6, %c0_7, %c0_8], %11 {strides = array<i32>} : memref<1x128x8xf32, #tpu.memory_space<vmem>>, vector<1x128x8xf32>,
    %c0_9 = arith.constant 0 : index
    %c0_10 = arith.constant 0 : index
    %c0_11 = arith.constant 0 : index
    %12 = vector.load %arg6[%c0_9, %c0_10, %c0_11] : memref<1x32x8xf32, #tpu.memory_space<vmem>>, vector<1x32x8xf32>
    %13 = vector.shape_cast %12 : vector<1x32x8xf32> to vector<32x8xf32>
    %cst_12 = arith.constant dense<0.000000e+00> : vector<128x8xf32>
    %14 = tpu.matmul %3, %13, %cst_12 {dimension_numbers = #tpu.dot_dimension_numbers<[1], [0], [0], [1], [0, 0, 1, 1], [], []>} : vector<128x32xf32>, vector<32x8xf32>, vector<128x8xf32> -> vector<128x8xf32>
    %c0_13 = arith.constant 0 : index
    %c0_14 = arith.constant 0 : index
    %c0_15 = arith.constant 0 : index
    %15 = vector.load %arg9[%c0_13, %c0_14, %c0_15] : memref<1x128x8xf32, #tpu.memory_space<vmem>>, vector<1x128x8xf32>
    %16 = vector.shape_cast %15 : vector<1x128x8xf32> to vector<128x8xf32>
    %17 = vector.shape_cast %14 : vector<128x8xf32> to vector<1x128x8xf32>
    tpu.vector_store %arg9[%c0_13, %c0_14, %c0_15], %17 {strides = array<i32>} : memref<1x128x8xf32, #tpu.memory_space<vmem>>, vector<1x128x8xf32>,
    %c0_16 = arith.constant 0 : index
    %c0_17 = arith.constant 0 : index
    %c0_18 = arith.constant 0 : index
    %18 = vector.load %arg7[%c0_16, %c0_17, %c0_18] : memref<1x32x8xf32, #tpu.memory_space<vmem>>, vector<1x32x8xf32>
    %19 = vector.shape_cast %18 : vector<1x32x8xf32> to vector<32x8xf32>
    %cst_19 = arith.constant dense<0.000000e+00> : vector<128x8xf32>
    %20 = tpu.matmul %3, %19, %cst_19 {dimension_numbers = #tpu.dot_dimension_numbers<[1], [0], [0], [1], [0, 0, 1, 1], [], []>} : vector<128x32xf32>, vector<32x8xf32>, vector<128x8xf32> -> vector<128x8xf32>
    %c0_20 = arith.constant 0 : index
    %c0_21 = arith.constant 0 : index
    %c0_22 = arith.constant 0 : index
    %21 = vector.load %arg10[%c0_20, %c0_21, %c0_22] : memref<1x128x8xf32, #tpu.memory_space<vmem>>, vector<1x128x8xf32>
    %22 = vector.shape_cast %21 : vector<1x128x8xf32> to vector<128x8xf32>
    %23 = vector.shape_cast %20 : vector<128x8xf32> to vector<1x128x8xf32>
    tpu.vector_store %arg10[%c0_20, %c0_21, %c0_22], %23 {strides = array<i32>} : memref<1x128x8xf32, #tpu.memory_space<vmem>>, vector<1x128x8xf32>,
    return
  }
  func.func @transform_0(%arg0: i32, %arg1: i32) -> (i32, i32) {
    %c0_i32 = arith.constant 0 : i32
    %c0_i32_0 = arith.constant 0 : i32
    return %arg0, %c0_i32 : i32, i32
  }
  func.func @transform_1(%arg0: i32, %arg1: i32) -> (i32, i32) {
    %c0_i32 = arith.constant 0 : i32
    %c0_i32_0 = arith.constant 0 : i32
    %c0_i32_1 = arith.constant 0 : i32
    return %c0_i32, %c0_i32_0 : i32, i32
  }
  func.func @transform_2(%arg0: i32, %arg1: i32) -> (i32, i32) {
    %c0_i32 = arith.constant 0 : i32
    %c0_i32_0 = arith.constant 0 : i32
    %c0_i32_1 = arith.constant 0 : i32
    return %c0_i32, %c0_i32_0 : i32, i32
  }
  func.func @transform_3(%arg0: i32, %arg1: i32) -> (i32, i32, i32) {
    %c0_i32 = arith.constant 0 : i32
    %c0_i32_0 = arith.constant 0 : i32
    %c0_i32_1 = arith.constant 0 : i32
    return %arg1, %c0_i32, %c0_i32_0 : i32, i32, i32
  }
  func.func @transform_4(%arg0: i32, %arg1: i32) -> (i32, i32, i32) {
    %c0_i32 = arith.constant 0 : i32
    %c0_i32_0 = arith.constant 0 : i32
    %c0_i32_1 = arith.constant 0 : i32
    return %arg1, %c0_i32, %c0_i32_0 : i32, i32, i32
  }
  func.func @transform_5(%arg0: i32, %arg1: i32) -> (i32, i32, i32) {
    %c0_i32 = arith.constant 0 : i32
    %c0_i32_0 = arith.constant 0 : i32
    %c0_i32_1 = arith.constant 0 : i32
    return %arg1, %c0_i32, %c0_i32_0 : i32, i32, i32
  }
  func.func @transform_6(%arg0: i32, %arg1: i32) -> (i32, i32, i32) {
    %c0_i32 = arith.constant 0 : i32
    %c0_i32_0 = arith.constant 0 : i32
    return %arg1, %arg0, %c0_i32 : i32, i32, i32
  }
  func.func @transform_7(%arg0: i32, %arg1: i32) -> (i32, i32, i32) {
    %c0_i32 = arith.constant 0 : i32
    %c0_i32_0 = arith.constant 0 : i32
    return %arg1, %arg0, %c0_i32 : i32, i32, i32
  }
  func.func @transform_8(%arg0: i32, %arg1: i32) -> (i32, i32, i32) {
    %c0_i32 = arith.constant 0 : i32
    %c0_i32_0 = arith.constant 0 : i32
    return %arg1, %arg0, %c0_i32 : i32, i32, i32
  }
}

</mosaic_0001>

<bundles_post_ra>
// kernel: tpu_custom_call.1
= control target key start
LH: loop header
LB: loop body
LE: loop exit
PB: predicated region body
PF: predicated region fallthrough
CT: control target
= control target key end

     0   :  { %s1893_s27 = smov 0   ;;  %s1895_s28 = smov 0   ;;  %s2384_s0 = inlined_call_operand.vmem [shape: f32[128,32], index: 0, kind: input, shape index: {}]   ;;  %s2385_s1 = inlined_call_operand.vmem [shape: f32[1,32], index: 1, kind: input, shape index: {}]   ;;  %s2386_s2 = inlined_call_operand.vmem [shape: f32[1,32], index: 2, kind: input, shape index: {}]   ;;  %s2387_s3 = inlined_call_operand.vmem [shape: f32[4,32,8], index: 3, kind: input, shape index: {}]   ;;  %s2388_s4 = inlined_call_operand.vmem [shape: f32[4,32,8], index: 4, kind: input, shape index: {}]   ;;  %s2389_s5 = inlined_call_operand.vmem [shape: f32[4,32,8], index: 5, kind: input, shape index: {}]   ;;  %s2390_s6 = inlined_call_operand.vmem [shape: f32[4,128,8], index: 6, kind: output, shape index: {0}]   ;;  %s2391_s7 = inlined_call_operand.vmem [shape: f32[4,128,8], index: 7, kind: output, shape index: {1}]   ;;  %s2392_s8 = inlined_call_operand.vmem [shape: f32[4,128,8], index: 8, kind: output, shape index: {2}]  }
   0x1   :  { %s1897_s29 = smov 0  }
   0x2 LB: > { %s28_s30 = sadd.s32 1, %s1842_s28  ;;  %p1532_p0 = scmp.ge.s32.totalorder %s1846_s29, 1  ;;  %s1846_s29 = sphi %s1897_s29, %s19_s29   ;;  %s1842_s28 = sphi %s1895_s28, %s2394_s28   ;;  %s1838_s27 = sphi %s1893_s27, %s2393_s27  }
   0x3   : > { %p29_p1 = scmp.ge.s32.totalorder %s28_s30, 4  ;;  %p316_p2 = scmp.lt.s32.totalorder %s1846_s29, 5 }
   0x5   : > { %s2396_s30 = smov (%p29_p1, %s28_s30), 0  ;;  %p317_p3 = pnand %p1532_p0, %p316_p2 }
   0x6   : > { %p393_p4 = scmp.lt.s32.totalorder (!%p317_p3), %s1838_s27, 3  ;;  %p1545_p5 = scmp.ne.s32.totalorder (!%p317_p3), %s1838_s27, 0 }
   0x7   : > { %320 = sbr.rel (%p317_p3) target bundleno = 610 (0x262), region = 44 }
   0xc   : > { %s394_s9 = scalar_select %p393_p4, %s1838_s27, 3 }
   0xd   : > { %441 = sbr.rel (%p1545_p5) target bundleno = 360 (0x168), region = 48 }
   0xe   : > { %s1598_s10 = sshll.u32 %s394_s9, 5  ;;  %s1601_s11 = sshll.u32 %s394_s9, 7 }
   0xf   : > { %s1914_s14 = scalar_lea.vmem %s2387_s3, %s1598_s10  ;;  %s1919_s17 = scalar_lea.vmem %s2388_s4, %s1598_s10 }
  0x10   : > { %s1924_s20 = scalar_lea.vmem %s2389_s5, %s1598_s10  ;;  %s1929_s23 = scalar_lea.vmem %s2390_s6, %s1601_s11 }
  0x11   : > { %s1934_s26 = scalar_lea.vmem %s2391_s7, %s1601_s11  ;;  %s1939_s13 = scalar_lea.vmem %s2392_s8, %s1601_s11 }
  0x12   : > { %v442_v0 = vld [vmem:[%s2384_s0] sm:$0xff]  ;;  %vm458_vm0 = vcmask 261120   ;;  %v444_v1 = vld [vmem:[%s2384_s0 + $0x10] sm:$0xff]  ;;  %v443_v2 = vld [vmem:[%s2384_s0 + $0x8] sm:$0xff] }
  0x13   : > { %v459_v3 = vsel %vm458_vm0, %v442_v0, 0.0  ;;  %v465_v4 = vsel %vm458_vm0, %v444_v1, 0.0  ;;  %v445_v5 = vld [vmem:[%s2384_s0 + $0x18] sm:$0xff]  ;;  %v462_v6 = vsel %vm458_vm0, %v443_v2, 0.0  ;;  %v446_v8 = vld [vmem:[%s2384_s0 + $0x20] sm:$0xff]  ;;  %v447_v9 = vld [vmem:[%s2384_s0 + $0x28] sm:$0xff] }
  0x14   : > { %460 = vadd.xlane.f32.xlu0 %v459_v3  ;;  %466 = vadd.xlane.f32.xlu1 %v465_v4  ;;  %v468_v7 = vsel %vm458_vm0, %v445_v5, 0.0  ;;  %v471_v10 = vsel %vm458_vm0, %v446_v8, 0.0  ;;  %v474_v11 = vsel %vm458_vm0, %v447_v9, 0.0  ;;  %v1968_v12 = vld [vmem:[%s2384_s0 + $0x30] sm:$0xff]  ;;  %v1973_v13 = vld [vmem:[%s2384_s0 + $0x38] sm:$0xff]  ;;  %v1982_v16 = vld [vmem:[%s2384_s0 + $0x40] sm:$0xff] }
  0x15   : > { %v477_v14 = vsel %vm458_vm0, %v1968_v12, 0.0  ;;  %v480_v15 = vsel %vm458_vm0, %v1973_v13, 0.0  ;;  %v1987_v17 = vld [vmem:[%s2384_s0 + $0x48] sm:$0xff]  ;;  %v483_v18 = vsel %vm458_vm0, %v1982_v16, 0.0  ;;  %v1996_v20 = vld [vmem:[%s2384_s0 + $0x50] sm:$0xff]  ;;  %v2001_v21 = vld [vmem:[%s2384_s0 + $0x58] sm:$0xff] }
  0x16   : > { %v486_v19 = vsel %vm458_vm0, %v1987_v17, 0.0  ;;  %v489_v22 = vsel %vm458_vm0, %v1996_v20, 0.0  ;;  %v492_v23 = vsel %vm458_vm0, %v2001_v21, 0.0  ;;  %v2010_v24 = vld [vmem:[%s2384_s0 + $0x60] sm:$0xff]  ;;  %v2015_v25 = vld [vmem:[%s2384_s0 + $0x68] sm:$0xff]  ;;  %v2024_v28 = vld [vmem:[%s2384_s0 + $0x70] sm:$0xff] }
  0x17   : > { %v495_v26 = vsel %vm458_vm0, %v2010_v24, 0.0  ;;  %v498_v27 = vsel %vm458_vm0, %v2015_v25, 0.0  ;;  %v2029_v29 = vld [vmem:[%s2384_s0 + $0x78] sm:$0xff]  ;;  %v501_v30 = vsel %vm458_vm0, %v2024_v28, 0.0 }
  0x18   : > { %463 = vadd.xlane.f32.xlu0 %v462_v6  ;;  %469 = vadd.xlane.f32.xlu1 %v468_v7  ;;  %v504_v31 = vsel %vm458_vm0, %v2029_v29, 0.0 }
  0x1c   : > { %472 = vadd.xlane.f32.xlu0 %v471_v10  ;;  %475 = vadd.xlane.f32.xlu1 %v474_v11 }
  0x20   : > { %478 = vadd.xlane.f32.xlu0 %v477_v14  ;;  %481 = vadd.xlane.f32.xlu1 %v480_v15 }
  0x24   : > { %484 = vadd.xlane.f32.xlu0 %v483_v18  ;;  %487 = vadd.xlane.f32.xlu1 %v486_v19 }
  0x28   : > { %490 = vadd.xlane.f32.xlu0 %v489_v22  ;;  %493 = vadd.xlane.f32.xlu1 %v492_v23 }
  0x2c   : > { %496 = vadd.xlane.f32.xlu0 %v495_v26  ;;  %499 = vadd.xlane.f32.xlu1 %v498_v27 }
  0x30   : > { %502 = vadd.xlane.f32.xlu0 %v501_v30  ;;  %505 = vadd.xlane.f32.xlu1 %v504_v31 }
  0x9d   : > { %v461_v32 = vpop.xlane.xlu0 %460  ;;  %v467_v33 = vpop.xlane.xlu1 %466 }
  0x9e   : > { %v508_v34 = vmul.f32 0.03125, %v461_v32  ;;  %v510_v35 = vmul.f32 0.03125, %v467_v33 }
  0xa0   : > { %v2035_v36 = vsub.f32 %v442_v0, %v508_v34  ;;  %v2037_v37 = vsub.f32 %v444_v1, %v510_v35 }
  0xa1   : > { %v464_v38 = vpop.xlane.xlu0 %463  ;;  %v470_v39 = vpop.xlane.xlu1 %469 }
  0xa2   : > { %v509_v40 = vmul.f32 0.03125, %v464_v38  ;;  %v511_v41 = vmul.f32 0.03125, %v470_v39  ;;  %v540_v42 = vmul.f32 %v2035_v36, %v2035_v36  ;;  %v542_v43 = vmul.f32 %v2037_v37, %v2037_v37 }
  0xa4   : > { %v2043_v44 = vsub.f32 %v443_v2, %v509_v40  ;;  %v2045_v45 = vsub.f32 %v445_v5, %v511_v41  ;;  %v556_v46 = vsel %vm458_vm0, %v540_v42, 0.0  ;;  %v562_v49 = vsel %vm458_vm0, %v542_v43, 0.0 }
  0xa5   : > { %557 = vadd.xlane.f32.xlu0 %v556_v46  ;;  %v473_v47 = vpop.xlane.xlu0 %472  ;;  %v476_v48 = vpop.xlane.xlu1 %475 }
  0xa6   : > { %v512_v50 = vmul.f32 0.03125, %v473_v47  ;;  %v513_v51 = vmul.f32 0.03125, %v476_v48  ;;  %v541_v52 = vmul.f32 %v2043_v44, %v2043_v44  ;;  %v543_v53 = vmul.f32 %v2045_v45, %v2045_v45 }
  0xa8   : > { %v2053_v54 = vsub.f32 %v446_v8, %v512_v50  ;;  %v2055_v55 = vsub.f32 %v447_v9, %v513_v51  ;;  %v559_v56 = vsel %vm458_vm0, %v541_v52, 0.0  ;;  %v565_v59 = vsel %vm458_vm0, %v543_v53, 0.0 }
  0xa9   : > { %563 = vadd.xlane.f32.xlu0 %v562_v49  ;;  %560 = vadd.xlane.f32.xlu1 %v559_v56  ;;  %v479_v57 = vpop.xlane.xlu0 %478  ;;  %v482_v58 = vpop.xlane.xlu1 %481 }
  0xaa   : > { %v514_v60 = vmul.f32 0.03125, %v479_v57  ;;  %v515_v61 = vmul.f32 0.03125, %v482_v58  ;;  %v544_v62 = vmul.f32 %v2053_v54, %v2053_v54  ;;  %v545_v63 = vmul.f32 %v2055_v55, %v2055_v55 }
  0xac   : > { %v2064_v0 = vsub.f32 %v1968_v12, %v514_v60  ;;  %v2067_v1 = vsub.f32 %v1973_v13, %v515_v61  ;;  %v568_v2 = vsel %vm458_vm0, %v544_v62, 0.0  ;;  %v571_v5 = vsel %vm458_vm0, %v545_v63, 0.0 }
  0xad   : > { %566 = vadd.xlane.f32.xlu1 %v565_v59  ;;  %569 = vadd.xlane.f32.xlu0 %v568_v2  ;;  %v485_v3 = vpop.xlane.xlu0 %484  ;;  %v488_v4 = vpop.xlane.xlu1 %487 }
  0xae   : > { %v516_v6 = vmul.f32 0.03125, %v485_v3  ;;  %v517_v7 = vmul.f32 0.03125, %v488_v4  ;;  %v546_v8 = vmul.f32 %v2064_v0, %v2064_v0  ;;  %v547_v9 = vmul.f32 %v2067_v1, %v2067_v1 }
  0xb0   : > { %v2076_v10 = vsub.f32 %v1982_v16, %v516_v6  ;;  %v2079_v11 = vsub.f32 %v1987_v17, %v517_v7  ;;  %v574_v12 = vsel %vm458_vm0, %v546_v8, 0.0  ;;  %v577_v15 = vsel %vm458_vm0, %v547_v9, 0.0 }
  0xb1   : > { %572 = vadd.xlane.f32.xlu1 %v571_v5  ;;  %575 = vadd.xlane.f32.xlu0 %v574_v12  ;;  %v491_v13 = vpop.xlane.xlu0 %490  ;;  %v494_v14 = vpop.xlane.xlu1 %493 }
  0xb2   : > { %v518_v18 = vmul.f32 0.03125, %v491_v13  ;;  %v519_v19 = vmul.f32 0.03125, %v494_v14  ;;  %v548_v22 = vmul.f32 %v2076_v10, %v2076_v10  ;;  %v549_v16 = vmul.f32 %v2079_v11, %v2079_v11 }
  0xb4   : > { %v2088_v23 = vsub.f32 %v1996_v20, %v518_v18  ;;  %v2091_v17 = vsub.f32 %v2001_v21, %v519_v19  ;;  %v580_v26 = vsel %vm458_vm0, %v548_v22, 0.0  ;;  %v583_v31 = vsel %vm458_vm0, %v549_v16, 0.0 }
  0xb5   : > { %578 = vadd.xlane.f32.xlu1 %v577_v15  ;;  %581 = vadd.xlane.f32.xlu0 %v580_v26  ;;  %v497_v27 = vpop.xlane.xlu0 %496  ;;  %v500_v30 = vpop.xlane.xlu1 %499  ;;  %v2128_v26 = vld [vmem:[%s2385_s1] ss:$0 sm:$0xff] }
  0xb6   : > { %v520_v32 = vmul.f32 0.03125, %v497_v27  ;;  %v521_v33 = vmul.f32 0.03125, %v500_v30  ;;  %v550_v34 = vmul.f32 %v2088_v23, %v2088_v23  ;;  %v551_v20 = vmul.f32 %v2091_v17, %v2091_v17 }
  0xb8   : > { %v2100_v35 = vsub.f32 %v2010_v24, %v520_v32  ;;  %v2103_v21 = vsub.f32 %v2015_v25, %v521_v33  ;;  %v586_v38 = vsel %vm458_vm0, %v550_v34, 0.0  ;;  %v589_v41 = vsel %vm458_vm0, %v551_v20, 0.0  ;;  %v2134_v32 = vld [vmem:[%s2386_s2] ss:$0 sm:$0xff] }
  0xb9   : > { %584 = vadd.xlane.f32.xlu1 %v583_v31  ;;  %587 = vadd.xlane.f32.xlu0 %v586_v38  ;;  %v503_v39 = vpop.xlane.xlu0 %502  ;;  %v506_v40 = vpop.xlane.xlu1 %505 }
  0xba   : > { %v522_v42 = vmul.f32 0.03125, %v503_v39  ;;  %v523_v43 = vmul.f32 0.03125, %v506_v40  ;;  %v552_v46 = vmul.f32 %v2100_v35, %v2100_v35  ;;  %v553_v24 = vmul.f32 %v2103_v21, %v2103_v21 }
  0xbc   : > { %v2112_v47 = vsub.f32 %v2024_v28, %v522_v42  ;;  %v2115_v25 = vsub.f32 %v2029_v29, %v523_v43  ;;  %v592_v48 = vsel %vm458_vm0, %v552_v46, 0.0  ;;  %v595_v49 = vsel %vm458_vm0, %v553_v24, 0.0 }
  0xbd   : > { %590 = vadd.xlane.f32.xlu1 %v589_v41  ;;  %593 = vadd.xlane.f32.xlu0 %v592_v48 }
  0xbe   : > { %v554_v50 = vmul.f32 %v2112_v47, %v2112_v47  ;;  %v555_v51 = vmul.f32 %v2115_v25, %v2115_v25 }
  0xc0   : > { %v598_v52 = vsel %vm458_vm0, %v554_v50, 0.0  ;;  %v601_v28 = vsel %vm458_vm0, %v555_v51, 0.0 }
  0xc1   : > { %596 = vadd.xlane.f32.xlu1 %v595_v49  ;;  %599 = vadd.xlane.f32.xlu0 %v598_v52 }
  0xc5   : > { %602 = vadd.xlane.f32.xlu1 %v601_v28 }
 0x12e   : > { %v558_v29 = vpop.xlane.xlu0 %557 }
 0x12f   : > { %v604_v53 = vmul.f32 0.03125, %v558_v29 }
 0x131   : > { %v620_v56 = vadd.f32 1e-05, %v604_v53 }
 0x132   : > { %v561_v57 = vpop.xlane.xlu1 %560  ;;  %v564_v58 = vpop.xlane.xlu0 %563 }
 0x133   : > { %1792 = vrsqrt.f32 %v620_v56  ;;  %v605_v59 = vmul.f32 0.03125, %v561_v57  ;;  %v606_v60 = vmul.f32 0.03125, %v564_v58 }
 0x135   : > { %v621_v61 = vadd.f32 1e-05, %v605_v59  ;;  %v622_v62 = vadd.f32 1e-05, %v606_v60 }
 0x136   : > { %v567_v63 = vpop.xlane.xlu1 %566  ;;  %v570_v2 = vpop.xlane.xlu0 %569 }
 0x137   : > { %1794 = vrsqrt.f32 %v621_v61  ;;  %v607_v3 = vmul.f32 0.03125, %v567_v63  ;;  %v608_v4 = vmul.f32 0.03125, %v570_v2 }
 0x138   : > { %1796 = vrsqrt.f32 %v622_v62 }
 0x139   : > { %v623_v5 = vadd.f32 1e-05, %v607_v3  ;;  %v624_v6 = vadd.f32 1e-05, %v608_v4 }
 0x13a   : > { %v573_v7 = vpop.xlane.xlu1 %572  ;;  %v576_v8 = vpop.xlane.xlu0 %575 }
 0x13b   : > { %1798 = vrsqrt.f32 %v623_v5  ;;  %v609_v9 = vmul.f32 0.03125, %v573_v7  ;;  %v610_v12 = vmul.f32 0.03125, %v576_v8 }
 0x13c   : > { %1800 = vrsqrt.f32 %v624_v6 }
 0x13d   : > { %v625_v13 = vadd.f32 1e-05, %v609_v9  ;;  %v626_v14 = vadd.f32 1e-05, %v610_v12 }
 0x13e   : > { %v579_v15 = vpop.xlane.xlu1 %578  ;;  %v582_v18 = vpop.xlane.xlu0 %581 }
 0x13f   : > { %1802 = vrsqrt.f32 %v625_v13  ;;  %v611_v19 = vmul.f32 0.03125, %v579_v15  ;;  %v612_v22 = vmul.f32 0.03125, %v582_v18 }
 0x140   : > { %v1793_v16 = vpop.eup %1792  ;;  %1804 = vrsqrt.f32 %v626_v14 }
 0x141   : > { %v652_v27 = vmul.f32 %v1793_v16, %v2035_v36  ;;  %v627_v30 = vadd.f32 1e-05, %v611_v19  ;;  %v628_v31 = vadd.f32 1e-05, %v612_v22 }
 0x142   : > { %v585_v33 = vpop.xlane.xlu1 %584  ;;  %v588_v34 = vpop.xlane.xlu0 %587 }
 0x143   : > { %v675_v20 = vmul.f32 %v2128_v26, %v652_v27  ;;  %1806 = vrsqrt.f32 %v627_v30  ;;  %v613_v38 = vmul.f32 0.03125, %v585_v33  ;;  %v614_v39 = vmul.f32 0.03125, %v588_v34 }
 0x144   : > { %v1795_v40 = vpop.eup %1794  ;;  %1808 = vrsqrt.f32 %v628_v31 }
 0x145   : > { %v1797_v41 = vpop.eup %1796  ;;  %v698_v42 = vadd.f32 %v2134_v32, %v675_v20  ;;  %v653_v36 = vmul.f32 %v1795_v40, %v2043_v44  ;;  %v629_v43 = vadd.f32 1e-05, %v613_v38  ;;  %v630_v46 = vadd.f32 1e-05, %v614_v39 }
 0x146   : > { %v654_v24 = vmul.f32 %v1797_v41, %v2037_v37  ;;  %v591_v48 = vpop.xlane.xlu1 %590  ;;  %v594_v49 = vpop.xlane.xlu0 %593 }
 0x147   : > { %714 = vst.msk [vmem:[#allocation2] sm:$0xff] %vm458_vm0, %v698_v42  ;;  %v676_v50 = vmul.f32 %v2128_v26, %v653_v36  ;;  %1810 = vrsqrt.f32 %v629_v43  ;;  %v615_v51 = vmul.f32 0.03125, %v591_v48  ;;  %v616_v52 = vmul.f32 0.03125, %v594_v49 }
 0x148   : > { %v1799_v28 = vpop.eup %1798  ;;  %v677_v29 = vmul.f32 %v2128_v26, %v654_v24  ;;  %1812 = vrsqrt.f32 %v630_v46 }
 0x149   : > { %v1801_v53 = vpop.eup %1800  ;;  %v699_v44 = vadd.f32 %v2134_v32, %v676_v50  ;;  %v655_v56 = vmul.f32 %v1799_v28, %v2045_v45  ;;  %v631_v57 = vadd.f32 1e-05, %v615_v51  ;;  %v632_v37 = vadd.f32 1e-05, %v616_v52 }
 0x14a   : > { %v700_v58 = vadd.f32 %v2134_v32, %v677_v29  ;;  %v656_v59 = vmul.f32 %v1801_v53, %v2053_v54  ;;  %v597_v60 = vpop.xlane.xlu1 %596  ;;  %v600_v61 = vpop.xlane.xlu0 %599 }
 0x14b   : > { %715 = vst.msk [vmem:[#allocation2 + $0x8] sm:$0xff] %vm458_vm0, %v699_v44  ;;  %v678_v62 = vmul.f32 %v2128_v26, %v655_v56  ;;  %1814 = vrsqrt.f32 %v631_v57  ;;  %v617_v63 = vmul.f32 0.03125, %v597_v60  ;;  %v618_v2 = vmul.f32 0.03125, %v600_v61 }
 0x14c   : > { %v1803_v3 = vpop.eup %1802  ;;  %716 = vst.msk [vmem:[#allocation2 + $0x10] sm:$0xff] %vm458_vm0, %v700_v58  ;;  %v679_v45 = vmul.f32 %v2128_v26, %v656_v59  ;;  %1816 = vrsqrt.f32 %v632_v37 }
 0x14d   : > { %v1805_v4 = vpop.eup %1804  ;;  %v701_v5 = vadd.f32 %v2134_v32, %v678_v62  ;;  %v657_v54 = vmul.f32 %v1803_v3, %v2055_v55  ;;  %v633_v6 = vadd.f32 1e-05, %v617_v63  ;;  %v634_v7 = vadd.f32 1e-05, %v618_v2 }
 0x14e   : > { %v702_v8 = vadd.f32 %v2134_v32, %v679_v45  ;;  %v658_v9 = vmul.f32 %v1805_v4, %v2064_v0  ;;  %v603_v12 = vpop.xlane.xlu1 %602 }
 0x14f   : > { %717 = vst.msk [vmem:[#allocation2 + $0x18] sm:$0xff] %vm458_vm0, %v701_v5  ;;  %v680_v13 = vmul.f32 %v2128_v26, %v657_v54  ;;  %1818 = vrsqrt.f32 %v633_v6  ;;  %v619_v14 = vmul.f32 0.03125, %v603_v12 }
 0x150   : > { %v1807_v15 = vpop.eup %1806  ;;  %718 = vst.msk [vmem:[#allocation2 + $0x20] sm:$0xff] %vm458_vm0, %v702_v8  ;;  %v681_v18 = vmul.f32 %v2128_v26, %v658_v9  ;;  %1820 = vrsqrt.f32 %v634_v7 }
 0x151   : > { %v1809_v55 = vpop.eup %1808  ;;  %v703_v19 = vadd.f32 %v2134_v32, %v680_v13  ;;  %v659_v22 = vmul.f32 %v1807_v15, %v2067_v1  ;;  %v635_v16 = vadd.f32 1e-05, %v619_v14 }
 0x152   : > { %v704_v0 = vadd.f32 %v2134_v32, %v681_v18  ;;  %v660_v27 = vmul.f32 %v1809_v55, %v2076_v10 }
 0x153   : > { %719 = vst.msk [vmem:[#allocation2 + $0x28] sm:$0xff] %vm458_vm0, %v703_v19  ;;  %v682_v30 = vmul.f32 %v2128_v26, %v659_v22  ;;  %1822 = vrsqrt.f32 %v635_v16 }
 0x154   : > { %v1811_v31 = vpop.eup %1810  ;;  %720 = vst.msk [vmem:[#allocation2 + $0x30] sm:$0xff] %vm458_vm0, %v704_v0  ;;  %v683_v33 = vmul.f32 %v2128_v26, %v660_v27 }
 0x155   : > { %v1813_v34 = vpop.eup %1812  ;;  %v705_v20 = vadd.f32 %v2134_v32, %v682_v30  ;;  %v661_v1 = vmul.f32 %v1811_v31, %v2079_v11 }
 0x156   : > { %v706_v38 = vadd.f32 %v2134_v32, %v683_v33  ;;  %v662_v39 = vmul.f32 %v1813_v34, %v2088_v23 }
 0x157   : > { %721 = vst.msk [vmem:[#allocation2 + $0x38] sm:$0xff] %vm458_vm0, %v705_v20  ;;  %v684_v10 = vmul.f32 %v2128_v26, %v661_v1 }
 0x158   : > { %v1815_v40 = vpop.eup %1814  ;;  %722 = vst.msk [vmem:[#allocation2 + $0x40] sm:$0xff] %vm458_vm0, %v706_v38  ;;  %v685_v41 = vmul.f32 %v2128_v26, %v662_v39 }
 0x159   : > { %v1817_v42 = vpop.eup %1816  ;;  %v707_v36 = vadd.f32 %v2134_v32, %v684_v10  ;;  %v663_v43 = vmul.f32 %v1815_v40, %v2091_v17 }
 0x15a   : > { %v708_v11 = vadd.f32 %v2134_v32, %v685_v41  ;;  %v664_v46 = vmul.f32 %v1817_v42, %v2100_v35 }
 0x15b   : > { %723 = vst.msk [vmem:[#allocation2 + $0x48] sm:$0xff] %vm458_vm0, %v707_v36  ;;  %v686_v23 = vmul.f32 %v2128_v26, %v663_v43 }
 0x15c   : > { %v1819_v24 = vpop.eup %1818  ;;  %724 = vst.msk [vmem:[#allocation2 + $0x50] sm:$0xff] %vm458_vm0, %v708_v11  ;;  %v687_v48 = vmul.f32 %v2128_v26, %v664_v46 }
 0x15d   : > { %v1821_v49 = vpop.eup %1820  ;;  %v709_v50 = vadd.f32 %v2134_v32, %v686_v23  ;;  %v665_v51 = vmul.f32 %v1819_v24, %v2103_v21 }
 0x15e   : > { %v710_v17 = vadd.f32 %v2134_v32, %v687_v48  ;;  %v666_v52 = vmul.f32 %v1821_v49, %v2112_v47 }
 0x15f   : > { %725 = vst.msk [vmem:[#allocation2 + $0x58] sm:$0xff] %vm458_vm0, %v709_v50  ;;  %v688_v35 = vmul.f32 %v2128_v26, %v665_v51 }
 0x160   : > { %v1823_v28 = vpop.eup %1822  ;;  %726 = vst.msk [vmem:[#allocation2 + $0x60] sm:$0xff] %vm458_vm0, %v710_v17  ;;  %v689_v29 = vmul.f32 %v2128_v26, %v666_v52 }
 0x161   : > { %v711_v53 = vadd.f32 %v2134_v32, %v688_v35  ;;  %v667_v44 = vmul.f32 %v1823_v28, %v2115_v25 }
 0x162   : > { %v712_v56 = vadd.f32 %v2134_v32, %v689_v29 }
 0x163   : > { %727 = vst.msk [vmem:[#allocation2 + $0x68] sm:$0xff] %vm458_vm0, %v711_v53  ;;  %v690_v21 = vmul.f32 %v2128_v26, %v667_v44 }
 0x164   : > { %728 = vst.msk [vmem:[#allocation2 + $0x70] sm:$0xff] %vm458_vm0, %v712_v56 }
 0x165   : > { %v713_v47 = vadd.f32 %v2134_v32, %v690_v21 }
 0x167   : > { %729 = vst.msk [vmem:[#allocation2 + $0x78] sm:$0xff] %vm458_vm0, %v713_v47 }
 0x168 PF: > { %v749_v57 = vld [vmem:[%s1914_s14 + $0x18] sm:$0xff]  ;;  %v748_v37 = vld [vmem:[%s1914_s14 + $0x10] sm:$0xff]  ;;  %v747_v25 = vld [vmem:[%s1914_s14 + $0x8] sm:$0xff]  ;;  %vm750_vm1 = vcmask 261120   ;;  %vm960_vm2 = vcmask 64512  }
 0x169   : > { %1664 = vmatprep.subr.mxu0 %v749_v57  ;;  %1760 = vmatprep.subr.mxu1 %v749_v57  ;;  %v746_v26 = vld [vmem:[%s1914_s14] sm:$0xff]  ;;  %v731_v59 = vld [vmem:[#allocation2 + $0x8] sm:$0xff]  ;;  %v980_v61 = vld [vmem:[%s1919_s17 + $0x18] sm:$0xff] }
 0x16a   : > { %1665 = vmatpush3.msra.mxu0 %v749_v57  ;;  %1764 = vmatpush3.msra.mxu1 %v749_v57  ;;  %v730_v32 = vld [vmem:[#allocation2] sm:$0xff]  ;;  %v2205_v60 = vld [vmem:[#allocation2 + $0x48] sm:$0xff]  ;;  %v1145_v62 = vld [vmem:[%s1924_s20 + $0x18] sm:$0xff] }
 0x16b   : > { %1666 = vmatprep.subr.mxu0 %v748_v37  ;;  %1761 = vmatprep.subr.mxu1 %v748_v37  ;;  %v2203_v58 = vld [vmem:[#allocation2 + $0x40] sm:$0xff]  ;;  %v732_v63 = vld [vmem:[#allocation2 + $0x10] sm:$0xff]  ;;  %v733_v3 = vld [vmem:[#allocation2 + $0x18] sm:$0xff] }
 0x16c   : > { %1667 = vmatpush3.msra.mxu0 %v748_v37  ;;  %1765 = vmatpush3.msra.mxu1 %v748_v37  ;;  %v2215_v2 = vld [vmem:[#allocation2 + $0x50] sm:$0xff]  ;;  %v2217_v45 = vld [vmem:[#allocation2 + $0x58] sm:$0xff]  ;;  %v734_v54 = vld [vmem:[#allocation2 + $0x20] sm:$0xff] }
 0x16d   : > { %1668 = vmatprep.subr.mxu0 %v747_v25  ;;  %1762 = vmatprep.subr.mxu1 %v747_v25  ;;  %v979_v4 = vld [vmem:[%s1919_s17 + $0x10] sm:$0xff]  ;;  %v742_v6 = vld [vmem:[#allocation2 + $0x60] sm:$0xff]  ;;  %v735_v7 = vld [vmem:[#allocation2 + $0x28] sm:$0xff] }
 0x16e   : > { %1669 = vmatpush3.msra.mxu0 %v747_v25  ;;  %1766 = vmatpush3.msra.mxu1 %v747_v25  ;;  %v1144_v5 = vld [vmem:[%s1924_s20 + $0x10] sm:$0xff]  ;;  %v743_v8 = vld [vmem:[#allocation2 + $0x68] sm:$0xff]  ;;  %v737_v15 = vld [vmem:[#allocation2 + $0x38] sm:$0xff] }
 0x16f   : > { %1670 = vmatprep.subr.mxu0 %v746_v26  ;;  %1763 = vmatprep.subr.mxu1 %v746_v26  ;;  %v978_v9 = vld [vmem:[%s1919_s17 + $0x8] sm:$0xff]  ;;  %v736_v13 = vld [vmem:[#allocation2 + $0x30] sm:$0xff]  ;;  %v745_v18 = vld [vmem:[#allocation2 + $0x78] sm:$0xff] }
 0x170   : > { %1671 = vmatpush3.msra.mxu0 %v746_v26  ;;  %1767 = vmatpush3.msra.mxu1 %v746_v26  ;;  %v1143_v12 = vld [vmem:[%s1924_s20 + $0x8] sm:$0xff]  ;;  %v744_v14 = vld [vmem:[#allocation2 + $0x70] sm:$0xff]  ;;  %v977_v55 = vld [vmem:[%s1919_s17] sm:$0xff] }
 0x171   : > { %1672 = vmatprep.mubr.msk.f32.mxu0 %vm750_vm1, %v730_v32  ;;  %1684 = vmatprep.mubr.msk.f32.mxu1 %vm750_vm1, %v2203_v58  ;;  %v1142_v19 = vld [vmem:[%s1924_s20] sm:$0xff] }
 0x172   : > { %1673 = vmatmul.mubr.msk.f32.vlgmr.msra.gmra.mxu0 %vm750_vm1, %v731_v59  ;;  %1685 = vmatmul.mubr.msk.f32.vlgmr.msra.gmra.mxu1 %vm750_vm1, %v2205_v60 }
 0x173   : > { %1696 = vmatprep.subr.mxu1 %v980_v61  ;;  %1728 = vmatprep.subr.mxu0 %v1145_v62 }
 0x174   : > { %1697 = vmatpush3.msra.mxu1 %v980_v61  ;;  %1729 = vmatpush3.msra.mxu0 %v1145_v62 }
 0x175   : > { %1675 = vmatprep.mubr.msk.f32.mxu0 %vm750_vm1, %v732_v63  ;;  %1687 = vmatprep.mubr.msk.f32.mxu1 %vm750_vm1, %v2215_v2 }
 0x176   : > { %1676 = vmatmul.mubr.msk.f32.gmra.mxu0 %vm750_vm1, %v733_v3  ;;  %1688 = vmatmul.mubr.msk.f32.gmra.mxu1 %vm750_vm1, %v2217_v45 }
 0x177   : > { %1698 = vmatprep.subr.mxu1 %v979_v4  ;;  %1730 = vmatprep.subr.mxu0 %v1144_v5 }
 0x178   : > { %1699 = vmatpush3.msra.mxu1 %v979_v4  ;;  %1731 = vmatpush3.msra.mxu0 %v1144_v5 }
 0x179   : > { %1678 = vmatprep.mubr.msk.f32.mxu0 %vm750_vm1, %v734_v54  ;;  %1690 = vmatprep.mubr.msk.f32.mxu1 %vm750_vm1, %v742_v6 }
 0x17a   : > { %1679 = vmatmul.mubr.msk.f32.gmra.mxu0 %vm750_vm1, %v735_v7  ;;  %1691 = vmatmul.mubr.msk.f32.gmra.mxu1 %vm750_vm1, %v743_v8 }
 0x17b   : > { %1700 = vmatprep.subr.mxu1 %v978_v9  ;;  %1732 = vmatprep.subr.mxu0 %v1143_v12 }
 0x17c   : > { %1701 = vmatpush3.msra.mxu1 %v978_v9  ;;  %1733 = vmatpush3.msra.mxu0 %v1143_v12 }
 0x17d   : > { %1681 = vmatprep.mubr.msk.f32.mxu0 %vm750_vm1, %v736_v13  ;;  %1693 = vmatprep.mubr.msk.f32.mxu1 %vm750_vm1, %v744_v14 }
 0x17e   : > { %1682 = vmatmul.mubr.msk.f32.gmra.mxu0 %vm750_vm1, %v737_v15  ;;  %1694 = vmatmul.mubr.msk.f32.gmra.mxu1 %vm750_vm1, %v745_v18 }
 0x17f   : > { %1702 = vmatprep.subr.mxu1 %v977_v55  ;;  %1734 = vmatprep.subr.mxu0 %v1142_v19 }
 0x180   : > { %1703 = vmatpush3.msra.mxu1 %v977_v55  ;;  %1735 = vmatpush3.msra.mxu0 %v1142_v19 }
 0x181   : > { %1704 = vmatprep.mubr.msk.f32.mxu1 %vm750_vm1, %v730_v32  ;;  %1736 = vmatprep.mubr.msk.f32.mxu0 %vm750_vm1, %v730_v32 }
 0x182   : > { %1705 = vmatmul.mubr.msk.f32.vlgmr.msra.gmra.mxu1 %vm750_vm1, %v731_v59  ;;  %1737 = vmatmul.mubr.msk.f32.vlgmr.msra.gmra.mxu0 %vm750_vm1, %v731_v59 }
 0x183   : > { %1707 = vmatprep.mubr.msk.f32.mxu1 %vm750_vm1, %v732_v63  ;;  %1739 = vmatprep.mubr.msk.f32.mxu0 %vm750_vm1, %v732_v63 }
 0x186   : > { %1708 = vmatmul.mubr.msk.f32.gmra.mxu1 %vm750_vm1, %v733_v3  ;;  %1740 = vmatmul.mubr.msk.f32.gmra.mxu0 %vm750_vm1, %v733_v3 }
 0x187   : > { %1710 = vmatprep.mubr.msk.f32.mxu1 %vm750_vm1, %v734_v54  ;;  %1742 = vmatprep.mubr.msk.f32.mxu0 %vm750_vm1, %v734_v54 }
 0x18a   : > { %1711 = vmatmul.mubr.msk.f32.gmra.mxu1 %vm750_vm1, %v735_v7  ;;  %1743 = vmatmul.mubr.msk.f32.gmra.mxu0 %vm750_vm1, %v735_v7 }
 0x18b   : > { %1713 = vmatprep.mubr.msk.f32.mxu1 %vm750_vm1, %v736_v13  ;;  %1745 = vmatprep.mubr.msk.f32.mxu0 %vm750_vm1, %v736_v13 }
 0x18e   : > { %1714 = vmatmul.mubr.msk.f32.gmra.mxu1 %vm750_vm1, %v737_v15  ;;  %1746 = vmatmul.mubr.msk.f32.gmra.mxu0 %vm750_vm1, %v737_v15 }
 0x18f   : > { %1716 = vmatprep.mubr.msk.f32.mxu1 %vm750_vm1, %v2203_v58  ;;  %1748 = vmatprep.mubr.msk.f32.mxu0 %vm750_vm1, %v2203_v58 }
 0x192   : > { %1717 = vmatmul.mubr.msk.f32.gmra.mxu1 %vm750_vm1, %v2205_v60  ;;  %1749 = vmatmul.mubr.msk.f32.gmra.mxu0 %vm750_vm1, %v2205_v60 }
 0x193   : > { %1719 = vmatprep.mubr.msk.f32.mxu1 %vm750_vm1, %v2215_v2  ;;  %1751 = vmatprep.mubr.msk.f32.mxu0 %vm750_vm1, %v2215_v2 }
 0x196   : > { %1720 = vmatmul.mubr.msk.f32.gmra.mxu1 %vm750_vm1, %v2217_v45  ;;  %1752 = vmatmul.mubr.msk.f32.gmra.mxu0 %vm750_vm1, %v2217_v45 }
 0x197   : > { %1722 = vmatprep.mubr.msk.f32.mxu1 %vm750_vm1, %v742_v6  ;;  %1754 = vmatprep.mubr.msk.f32.mxu0 %vm750_vm1, %v742_v6 }
 0x19a   : > { %1723 = vmatmul.mubr.msk.f32.gmra.mxu1 %vm750_vm1, %v743_v8  ;;  %1755 = vmatmul.mubr.msk.f32.gmra.mxu0 %vm750_vm1, %v743_v8 }
 0x19b   : > { %1725 = vmatprep.mubr.msk.f32.mxu1 %vm750_vm1, %v744_v14  ;;  %1757 = vmatprep.mubr.msk.f32.mxu0 %vm750_vm1, %v744_v14 }
 0x19e   : > { %1726 = vmatmul.mubr.msk.f32.gmra.mxu1 %vm750_vm1, %v745_v18  ;;  %1758 = vmatmul.mubr.msk.f32.gmra.mxu0 %vm750_vm1, %v745_v18 }
 0x232   : > { %v1674_v22 = vpop.f32.mrf.mxu0  ;;  %v1686_v16 = vpop.f32.mrf.mxu1 }
 0x233   : > { %v945_v0 = vmul.f32 0.35355338, %v1674_v22  ;;  %v953_v27 = vmul.f32 0.35355338, %v1686_v16 }
 0x234   : > { %v865_v30 = vpop.f32.mrf.mxu0  ;;  %v905_v31 = vpop.f32.mrf.mxu1 }
 0x235   : > { %962 = vst.msk [vmem:[%s1929_s23 + $0x8] sm:$0xff] %vm960_vm2, %v945_v0  ;;  %970 = vst.msk [vmem:[%s1929_s23 + $0x48] sm:$0xff] %vm960_vm2, %v953_v27  ;;  %v944_v33 = vmul.f32 0.35355338, %v865_v30  ;;  %v952_v34 = vmul.f32 0.35355338, %v905_v31 }
 0x236   : > { %v1677_v20 = vpop.f32.mrf.mxu0  ;;  %v1689_v1 = vpop.f32.mrf.mxu1 }
 0x237   : > { %961 = vst.msk [vmem:[%s1929_s23] sm:$0xff] %vm960_vm2, %v944_v33  ;;  %969 = vst.msk [vmem:[%s1929_s23 + $0x40] sm:$0xff] %vm960_vm2, %v952_v34  ;;  %v947_v38 = vmul.f32 0.35355338, %v1677_v20  ;;  %v955_v39 = vmul.f32 0.35355338, %v1689_v1 }
 0x238   : > { %v875_v10 = vpop.f32.mrf.mxu0  ;;  %v915_v40 = vpop.f32.mrf.mxu1 }
 0x239   : > { %964 = vst.msk [vmem:[%s1929_s23 + $0x18] sm:$0xff] %vm960_vm2, %v947_v38  ;;  %972 = vst.msk [vmem:[%s1929_s23 + $0x58] sm:$0xff] %vm960_vm2, %v955_v39  ;;  %v946_v41 = vmul.f32 0.35355338, %v875_v10  ;;  %v954_v42 = vmul.f32 0.35355338, %v915_v40 }
 0x23a   : > { %v1680_v36 = vpop.f32.mrf.mxu0  ;;  %v1692_v43 = vpop.f32.mrf.mxu1 }
 0x23b   : > { %963 = vst.msk [vmem:[%s1929_s23 + $0x10] sm:$0xff] %vm960_vm2, %v946_v41  ;;  %971 = vst.msk [vmem:[%s1929_s23 + $0x50] sm:$0xff] %vm960_vm2, %v954_v42  ;;  %v949_v11 = vmul.f32 0.35355338, %v1680_v36  ;;  %v957_v46 = vmul.f32 0.35355338, %v1692_v43 }
 0x23c   : > { %v885_v23 = vpop.f32.mrf.mxu0  ;;  %v925_v24 = vpop.f32.mrf.mxu1 }
 0x23d   : > { %966 = vst.msk [vmem:[%s1929_s23 + $0x28] sm:$0xff] %vm960_vm2, %v949_v11  ;;  %974 = vst.msk [vmem:[%s1929_s23 + $0x68] sm:$0xff] %vm960_vm2, %v957_v46  ;;  %v948_v48 = vmul.f32 0.35355338, %v885_v23  ;;  %v956_v49 = vmul.f32 0.35355338, %v925_v24 }
 0x23e   : > { %v1683_v50 = vpop.f32.mrf.mxu0  ;;  %v1695_v51 = vpop.f32.mrf.mxu1 }
 0x23f   : > { %965 = vst.msk [vmem:[%s1929_s23 + $0x20] sm:$0xff] %vm960_vm2, %v948_v48  ;;  %973 = vst.msk [vmem:[%s1929_s23 + $0x60] sm:$0xff] %vm960_vm2, %v956_v49  ;;  %v951_v17 = vmul.f32 0.35355338, %v1683_v50  ;;  %v959_v52 = vmul.f32 0.35355338, %v1695_v51 }
 0x240   : > { %v895_v35 = vpop.f32.mrf.mxu0  ;;  %v935_v28 = vpop.f32.mrf.mxu1 }
 0x241   : > { %968 = vst.msk [vmem:[%s1929_s23 + $0x38] sm:$0xff] %vm960_vm2, %v951_v17  ;;  %976 = vst.msk [vmem:[%s1929_s23 + $0x78] sm:$0xff] %vm960_vm2, %v959_v52  ;;  %v950_v29 = vmul.f32 0.35355338, %v895_v35  ;;  %v958_v53 = vmul.f32 0.35355338, %v935_v28 }
 0x242   : > { %v1706_v44 = vpop.f32.mrf.mxu1  ;;  %v1738_v56 = vpop.f32.mrf.mxu0 }
 0x243   : > { %967 = vst.msk [vmem:[%s1929_s23 + $0x30] sm:$0xff] %vm960_vm2, %v950_v29  ;;  %975 = vst.msk [vmem:[%s1929_s23 + $0x70] sm:$0xff] %vm960_vm2, %v958_v53 }
 0x244   : > { %1127 = vst.msk [vmem:[%s1934_s26 + $0x8] sm:$0xff] %vm960_vm2, %v1706_v44  ;;  %1292 = vst.msk [vmem:[%s1939_s13 + $0x8] sm:$0xff] %vm960_vm2, %v1738_v56  ;;  %v1047_v21 = vpop.f32.mrf.mxu1  ;;  %v1212_v47 = vpop.f32.mrf.mxu0 }
 0x245   : > { %1126 = vst.msk [vmem:[%s1934_s26] sm:$0xff] %vm960_vm2, %v1047_v21  ;;  %1291 = vst.msk [vmem:[%s1939_s13] sm:$0xff] %vm960_vm2, %v1212_v47 }
 0x246   : > { %v1709_v57 = vpop.f32.mrf.mxu1  ;;  %v1741_v37 = vpop.f32.mrf.mxu0 }
 0x247   : > { %1129 = vst.msk [vmem:[%s1934_s26 + $0x18] sm:$0xff] %vm960_vm2, %v1709_v57  ;;  %1294 = vst.msk [vmem:[%s1939_s13 + $0x18] sm:$0xff] %vm960_vm2, %v1741_v37 }
 0x248   : > { %v1057_v25 = vpop.f32.mrf.mxu1  ;;  %v1222_v26 = vpop.f32.mrf.mxu0 }
 0x249   : > { %1128 = vst.msk [vmem:[%s1934_s26 + $0x10] sm:$0xff] %vm960_vm2, %v1057_v25  ;;  %1293 = vst.msk [vmem:[%s1939_s13 + $0x10] sm:$0xff] %vm960_vm2, %v1222_v26 }
 0x24a   : > { %v1712_v32 = vpop.f32.mrf.mxu1  ;;  %v1744_v58 = vpop.f32.mrf.mxu0 }
 0x24b   : > { %1131 = vst.msk [vmem:[%s1934_s26 + $0x28] sm:$0xff] %vm960_vm2, %v1712_v32  ;;  %1296 = vst.msk [vmem:[%s1939_s13 + $0x28] sm:$0xff] %vm960_vm2, %v1744_v58 }
 0x24c   : > { %v1067_v59 = vpop.f32.mrf.mxu1  ;;  %v1232_v60 = vpop.f32.mrf.mxu0 }
 0x24d   : > { %1130 = vst.msk [vmem:[%s1934_s26 + $0x20] sm:$0xff] %vm960_vm2, %v1067_v59  ;;  %1295 = vst.msk [vmem:[%s1939_s13 + $0x20] sm:$0xff] %vm960_vm2, %v1232_v60 }
 0x24e   : > { %v1715_v61 = vpop.f32.mrf.mxu1  ;;  %v1747_v62 = vpop.f32.mrf.mxu0 }
 0x24f   : > { %1133 = vst.msk [vmem:[%s1934_s26 + $0x38] sm:$0xff] %vm960_vm2, %v1715_v61  ;;  %1298 = vst.msk [vmem:[%s1939_s13 + $0x38] sm:$0xff] %vm960_vm2, %v1747_v62 }
 0x250   : > { %v1077_v63 = vpop.f32.mrf.mxu1  ;;  %v1242_v2 = vpop.f32.mrf.mxu0 }
 0x251   : > { %1132 = vst.msk [vmem:[%s1934_s26 + $0x30] sm:$0xff] %vm960_vm2, %v1077_v63  ;;  %1297 = vst.msk [vmem:[%s1939_s13 + $0x30] sm:$0xff] %vm960_vm2, %v1242_v2 }
 0x252   : > { %v1718_v3 = vpop.f32.mrf.mxu1  ;;  %v1750_v45 = vpop.f32.mrf.mxu0 }
 0x253   : > { %1135 = vst.msk [vmem:[%s1934_s26 + $0x48] sm:$0xff] %vm960_vm2, %v1718_v3  ;;  %1300 = vst.msk [vmem:[%s1939_s13 + $0x48] sm:$0xff] %vm960_vm2, %v1750_v45 }
 0x254   : > { %v1087_v4 = vpop.f32.mrf.mxu1  ;;  %v1252_v5 = vpop.f32.mrf.mxu0 }
 0x255   : > { %1134 = vst.msk [vmem:[%s1934_s26 + $0x40] sm:$0xff] %vm960_vm2, %v1087_v4  ;;  %1299 = vst.msk [vmem:[%s1939_s13 + $0x40] sm:$0xff] %vm960_vm2, %v1252_v5 }
 0x256   : > { %v1721_v54 = vpop.f32.mrf.mxu1  ;;  %v1753_v6 = vpop.f32.mrf.mxu0 }
 0x257   : > { %1137 = vst.msk [vmem:[%s1934_s26 + $0x58] sm:$0xff] %vm960_vm2, %v1721_v54  ;;  %1302 = vst.msk [vmem:[%s1939_s13 + $0x58] sm:$0xff] %vm960_vm2, %v1753_v6 }
 0x258   : > { %v1097_v7 = vpop.f32.mrf.mxu1  ;;  %v1262_v8 = vpop.f32.mrf.mxu0 }
 0x259   : > { %1136 = vst.msk [vmem:[%s1934_s26 + $0x50] sm:$0xff] %vm960_vm2, %v1097_v7  ;;  %1301 = vst.msk [vmem:[%s1939_s13 + $0x50] sm:$0xff] %vm960_vm2, %v1262_v8 }
 0x25a   : > { %v1724_v9 = vpop.f32.mrf.mxu1  ;;  %v1756_v12 = vpop.f32.mrf.mxu0 }
 0x25b   : > { %1139 = vst.msk [vmem:[%s1934_s26 + $0x68] sm:$0xff] %vm960_vm2, %v1724_v9  ;;  %1304 = vst.msk [vmem:[%s1939_s13 + $0x68] sm:$0xff] %vm960_vm2, %v1756_v12 }
 0x25c   : > { %v1107_v13 = vpop.f32.mrf.mxu1  ;;  %v1272_v14 = vpop.f32.mrf.mxu0 }
 0x25d   : > { %1138 = vst.msk [vmem:[%s1934_s26 + $0x60] sm:$0xff] %vm960_vm2, %v1107_v13  ;;  %1303 = vst.msk [vmem:[%s1939_s13 + $0x60] sm:$0xff] %vm960_vm2, %v1272_v14 }
 0x25e   : > { %v1727_v15 = vpop.f32.mrf.mxu1  ;;  %v1759_v18 = vpop.f32.mrf.mxu0 }
 0x25f   : > { %1141 = vst.msk [vmem:[%s1934_s26 + $0x78] sm:$0xff] %vm960_vm2, %v1727_v15  ;;  %1306 = vst.msk [vmem:[%s1939_s13 + $0x78] sm:$0xff] %vm960_vm2, %v1759_v18 }
 0x260   : > { %v1117_v55 = vpop.f32.mrf.mxu1  ;;  %v1282_v19 = vpop.f32.mrf.mxu0 }
 0x261   : > { %1140 = vst.msk [vmem:[%s1934_s26 + $0x70] sm:$0xff] %vm960_vm2, %v1117_v55  ;;  %1305 = vst.msk [vmem:[%s1939_s13 + $0x70] sm:$0xff] %vm960_vm2, %v1282_v19 }
 0x262 PF: > { %s19_s29 = sadd.s32 1, %s1846_s29   ;;  %s2393_s27 = smov %s1842_s28 }
 0x263   : > { %p16_p6 = scmp.ge.s32.totalorder %s19_s29, 6   ;;  %s2394_s28 = smov %s2396_s30 }
 0x265   :  { %18 = sbr.rel (!%p16_p6) target bundleno = 2 (0x2), region = 111 }

</bundles_post_ra>
